<compile_context>
chip_gen: v7x
topology: tpu7x:2x2x1
jax: 0.10.0
libtpu: 0.0.40
codegen_flags: <defaults>
</compile_context>

<pallas_src>
import functools
import math

import numpy as np
import jax
import jax.numpy as jnp
from jax.experimental import pallas as pl
from jax.experimental.pallas import tpu as pltpu


_MASK_VALUE = -0.7 * float(np.finfo(np.float32).max)


def _pick_tile(dim, preferred):
    """Largest preferred tile that divides dim, else the full dim (legal block)."""
    for p in preferred:
        if dim % p == 0:
            return p
    return dim


# ----------------------------- Pallas kernels ------------------------------ #

def _qkv_proj_kernel(x_ref, w_ref, b_ref, o_ref, acc_ref):
    # x: (tm, tk) bf16, w: (tn, tk) bf16 (torch F.linear layout), b: (1, tn) f32.
    k = pl.program_id(2)

    @pl.when(k == 0)
    def _():
        acc_ref[...] = jnp.zeros(acc_ref.shape, acc_ref.dtype)

    acc_ref[...] += jax.lax.dot_general(
        x_ref[...], w_ref[...],
        dimension_numbers=(((1,), (1,)), ((), ())),   # contract last dims (x @ W.T)
        preferred_element_type=jnp.float32)

    @pl.when(k == pl.num_programs(2) - 1)
    def _():
        o_ref[...] = (acc_ref[...] + b_ref[...]).astype(o_ref.dtype)


def _flash_attn_kernel(segq_ref, segk_ref, q_ref, k_ref, v_ref, o_ref,
                       m_ref, l_ref, acc_ref, *,
                       scale, heads_per_block, head_dim):
    """One (head_group, q_block) tile; online softmax over the kv grid axis."""
    ki = pl.program_id(2)
    nk = pl.num_programs(2)
    g, d = heads_per_block, head_dim
    tq = q_ref.shape[0]
    tk = k_ref.shape[0]

    @pl.when(ki == 0)
    def _():
        m_ref[...] = jnp.full(m_ref.shape, -jnp.inf, m_ref.dtype)
        l_ref[...] = jnp.zeros(l_ref.shape, l_ref.dtype)
        acc_ref[...] = jnp.zeros(acc_ref.shape, acc_ref.dtype)

    # Block-diagonal varlen mask for this (tq, tk) tile.
    mask = (jnp.broadcast_to(segq_ref[...], (tq, tk)) ==
            jnp.broadcast_to(segk_ref[...], (tq, tk)))

    q = q_ref[...]            # (tq, g*d) bf16
    k = k_ref[...]            # (tk, g*d) bf16
    v = v_ref[...]            # (tk, g*d) bf16

    for hi in range(g):       # small static unroll over heads in this group
        lo = hi * d
        qh = q[:, lo:lo + d]
        kh = k[:, lo:lo + d]
        vh = v[:, lo:lo + d]

        s = jax.lax.dot_general(qh, kh, (((1,), (1,)), ((), ())),
                                preferred_element_type=jnp.float32)
        s = s * scale
        s = jnp.where(mask, s, _MASK_VALUE)

        m_prev = m_ref[hi]                                  # (tq, 1) f32
        l_prev = l_ref[hi]                                  # (tq, 1) f32
        m_new = jnp.maximum(m_prev, jnp.max(s, axis=-1, keepdims=True))
        alpha = jnp.exp(m_prev - m_new)
        p = jnp.exp(s - m_new)                              # (tq, tk) f32

        l_ref[hi] = alpha * l_prev + jnp.sum(p, axis=-1, keepdims=True)
        pv = jax.lax.dot_general(p.astype(v.dtype), vh, (((1,), (0,)), ((), ())),
                                 preferred_element_type=jnp.float32)
        acc_ref[hi] = alpha * acc_ref[hi] + pv
        m_ref[hi] = m_new

    @pl.when(ki == nk - 1)
    def _():
        outs = []
        for hi in range(g):
            inv = pl.reciprocal(l_ref[hi], approx=True)     # EUP slot, cheap
            outs.append(acc_ref[hi] * inv)
        out = outs[0] if g == 1 else jnp.concatenate(outs, axis=-1)
        o_ref[...] = out.astype(o_ref.dtype)


# ------------------------------- Wrapper ----------------------------------- #

def fmha_forward(hidden_states, cu_seqlens, max_s, Wqkv, Bqkv, num_heads,
                 p_dropout=0.0, is_training=True):
    """Equivalent of FMHA.forward: qkv = linear(x, Wqkv, Bqkv); varlen MHA."""
    # TODO(synk): attention dropout (p_dropout > 0) of mha.fwd is stochastic and
    # is not reproduced here; forward semantics match exactly for p_dropout == 0.
    del max_s, is_training, p_dropout

    T, H = hidden_states.shape
    h = num_heads
    d = H // h
    assert d * h == H, "Invalid hidden size/num_heads"

    out_dtype = hidden_states.dtype
    compute_dtype = jnp.bfloat16

    x = hidden_states.astype(compute_dtype)
    w = Wqkv.astype(compute_dtype)                       # (3H, H), no transpose in HBM
    b = Bqkv.reshape(1, 3 * H).astype(jnp.float32)

    # ---- tiled fused QKV projection: (T, H) x (3H, H)^T + b -> (T, 3H) ----
    tm = _pick_tile(T, (256, 128))
    tn = _pick_tile(3 * H, (512, 256, 128))
    tkh = _pick_tile(H, (512, 256, 128))
    qkv = pl.pallas_call(
        _qkv_proj_kernel,
        out_shape=jax.ShapeDtypeStruct((T, 3 * H), compute_dtype),
        grid_spec=pltpu.PrefetchScalarGridSpec(
            num_scalar_prefetch=0,
            grid=(T // tm, (3 * H) // tn, H // tkh),
            in_specs=[
                pl.BlockSpec((tm, tkh), lambda i, j, k: (i, k)),
                pl.BlockSpec((tn, tkh), lambda i, j, k: (j, k)),
                pl.BlockSpec((1, tn), lambda i, j, k: (0, j)),
            ],
            out_specs=pl.BlockSpec((tm, tn), lambda i, j, k: (i, j)),
            scratch_shapes=[pltpu.VMEM((tm, tn), jnp.float32)],
        ),
        compiler_params=pltpu.CompilerParams(
            dimension_semantics=("parallel", "parallel", "arbitrary"),
            vmem_limit_bytes=48 * 1024 * 1024),
    )(x, w, b)

    # ---- per-token segment ids from cu_seqlens (varlen packing) ----
    # Note: any tokens >= cu_seqlens[-1] share the last segment id (same as ref).
    seg = (jnp.searchsorted(cu_seqlens.astype(jnp.int32),
                            jnp.arange(T, dtype=jnp.int32),
                            side="right") - 1).astype(jnp.int32)
    seg_row = seg.reshape(T, 1)
    seg_col = seg.reshape(1, T)

    # ---- head grouping so that per-block lane width is 128-aligned ----
    g = 128 // math.gcd(d, 128)       # heads per attention block
    # TODO(synk): head_dim/num_heads combos where (g*d) % 128 != 0 or h % g != 0
    # would need a padded / full-width fallback; BERT configs (d=64,128) are fine.
    assert (g * d) % 128 == 0, "head_dim not 128-alignable by head grouping"
    assert h % g == 0, "num_heads must be divisible by heads-per-block"
    gd = g * d
    ngh = h // g                      # number of head-group column blocks per Q/K/V

    tq = _pick_tile(T, (256, 128))
    tk = _pick_tile(T, (256, 128))
    scale = 1.0 / float(np.sqrt(d))
    kernel = functools.partial(_flash_attn_kernel, scale=scale,
                               heads_per_block=g, head_dim=d)

    # ---- flash-style varlen multi-head attention, output directly in (T, H) ----
    out = pl.pallas_call(
        kernel,
        out_shape=jax.ShapeDtypeStruct((T, H), out_dtype),
        grid_spec=pltpu.PrefetchScalarGridSpec(
            num_scalar_prefetch=0,
            grid=(ngh, T // tq, T // tk),
            in_specs=[
                pl.BlockSpec((tq, 1), lambda j, qi, ki: (qi, 0)),            # seg rows
                pl.BlockSpec((1, tk), lambda j, qi, ki: (0, ki)),            # seg cols
                pl.BlockSpec((tq, gd), lambda j, qi, ki: (qi, j)),           # Q group
                pl.BlockSpec((tk, gd), lambda j, qi, ki: (ki, ngh + j)),     # K group
                pl.BlockSpec((tk, gd), lambda j, qi, ki: (ki, 2 * ngh + j)), # V group
            ],
            out_specs=pl.BlockSpec((tq, gd), lambda j, qi, ki: (qi, j)),
            scratch_shapes=[
                pltpu.VMEM((g, tq, 1), jnp.float32),   # running max
                pltpu.VMEM((g, tq, 1), jnp.float32),   # running sum
                pltpu.VMEM((g, tq, d), jnp.float32),   # output accumulator
            ],
        ),
        compiler_params=pltpu.CompilerParams(
            dimension_semantics=("parallel", "parallel", "arbitrary"),
            vmem_limit_bytes=48 * 1024 * 1024),
    )(seg_row, seg_col, qkv, qkv, qkv)

    return out      # already (T, H), mirrors ctx.view(-1, hidden_size)


# ------------------------------ Reference ----------------------------------- #

def _reference(hidden_states, cu_seqlens, Wqkv, Bqkv, num_heads):
    T, H = hidden_states.shape
    h = num_heads
    d = H // h
    # Mirror the kernel's bf16 operand precision for the comparison.
    x = hidden_states.astype(jnp.bfloat16).astype(jnp.float32)
    W = Wqkv.astype(jnp.bfloat16).astype(jnp.float32)
    qkv = x @ W.T + Bqkv
    q = qkv[:, :H].reshape(T, h, d)
    k = qkv[:, H:2 * H].reshape(T, h, d)
    v = qkv[:, 2 * H:].reshape(T, h, d)
    seg = jnp.searchsorted(cu_seqlens, jnp.arange(T), side="right") - 1
    mask = seg[:, None] == seg[None, :]
    s = jnp.einsum("thd,shd->hts", q, k) / np.sqrt(d)
    s = jnp.where(mask[None], s, -1e30)
    p = jax.nn.softmax(s, axis=-1)
    o = jnp.einsum("hts,shd->thd", p, v)
    return o.reshape(T, H)


# --------------------------------- Main ------------------------------------- #

if __name__ == "__main__":
    # Small but tileable config: hidden=256, heads=4 (head_dim=64 -> 2 heads per
    # block), 2 packed sequences of lengths 192 and 320 -> total_tokens=512, so
    # the flash kernel exercises multiple q and kv tiles.
    hidden_size = 256
    num_heads = 4
    seqlens = [192, 320]
    total_tokens = sum(seqlens)
    max_s = max(seqlens)

    key = jax.random.PRNGKey(0)
    kx, kw, kb = jax.random.split(key, 3)
    hidden_states = jax.random.normal(kx, (total_tokens, hidden_size),
                                      dtype=jnp.float32)
    Wqkv = 0.05 * jax.random.normal(kw, (3 * hidden_size, hidden_size),
                                    dtype=jnp.float32)
    Bqkv = 0.05 * jax.random.normal(kb, (3 * hidden_size,), dtype=jnp.float32)
    cu_seqlens = jnp.array(np.concatenate([[0], np.cumsum(seqlens)]),
                           dtype=jnp.int32)

    out = fmha_forward(hidden_states, cu_seqlens, max_s, Wqkv, Bqkv, num_heads,
                       p_dropout=0.0, is_training=True)
    out = jax.block_until_ready(out)

    ref = jax.block_until_ready(
        _reference(hidden_states, cu_seqlens, Wqkv, Bqkv, num_heads))
    np.testing.assert_allclose(np.asarray(out, dtype=np.float32),
                               np.asarray(ref, dtype=np.float32),
                               rtol=2e-2, atol=2e-2)

    print("KERNEL_OK")
</pallas_src>

<mosaic_0001>
module attributes {stable_mosaic.version = 11 : i64} {
  func.func @_qkv_proj_kernel(%arg0: i32, %arg1: i32, %arg2: i32, %arg3: memref<256x256xbf16, #tpu.memory_space<vmem>>, %arg4: memref<256x256xbf16, #tpu.memory_space<vmem>>, %arg5: memref<1x256xf32, #tpu.memory_space<vmem>>, %arg6: memref<256x256xbf16, #tpu.memory_space<vmem>>, %arg7: memref<256x256xf32, #tpu.memory_space<vmem>>) attributes {dimension_semantics = [#tpu.dimension_semantics<parallel>, #tpu.dimension_semantics<parallel>, #tpu.dimension_semantics<arbitrary>], iteration_bounds = array<i64: 2, 3, 1>, scalar_prefetch = 0 : i64, scratch_operands = 1 : i64, tpu.core_type = #tpu.core_type<tc>, window_params = [{transform_indices = @transform_0, window_bounds = array<i64: 256, 256>}, {transform_indices = @transform_1, window_bounds = array<i64: 256, 256>}, {transform_indices = @transform_2, window_bounds = array<i64: 1, 256>}, {transform_indices = @transform_3, window_bounds = array<i64: 256, 256>}]} {
    %c0_i32 = arith.constant 0 : i32
    %0 = arith.cmpi eq, %arg2, %c0_i32 : i32
    %1 = arith.extui %0 : i1 to i32
    %c0_i32_0 = arith.constant 0 : i32
    %2 = arith.cmpi ne, %1, %c0_i32_0 : i32
    scf.if %2 {
      %cst_10 = arith.constant 0.000000e+00 : f32
      %12 = vector.broadcast %cst_10 : f32 to vector<256x256xf32>
      %c0_11 = arith.constant 0 : index
      %c0_12 = arith.constant 0 : index
      %13 = vector.load %arg7[%c0_11, %c0_12] : memref<256x256xf32, #tpu.memory_space<vmem>>, vector<256x256xf32>
      tpu.vector_store %arg7[%c0_11, %c0_12], %12 {strides = array<i32>} : memref<256x256xf32, #tpu.memory_space<vmem>>, vector<256x256xf32>,
    } else {
    }
    %c0 = arith.constant 0 : index
    %c0_1 = arith.constant 0 : index
    %3 = vector.load %arg7[%c0, %c0_1] : memref<256x256xf32, #tpu.memory_space<vmem>>, vector<256x256xf32>
    %c0_2 = arith.constant 0 : index
    %c0_3 = arith.constant 0 : index
    %4 = vector.load %arg3[%c0_2, %c0_3] : memref<256x256xbf16, #tpu.memory_space<vmem>>, vector<256x256xbf16>
    %c0_4 = arith.constant 0 : index
    %c0_5 = arith.constant 0 : index
    %5 = vector.load %arg4[%c0_4, %c0_5] : memref<256x256xbf16, #tpu.memory_space<vmem>>, vector<256x256xbf16>
    %cst = arith.constant dense<0.000000e+00> : vector<256x256xf32>
    %6 = tpu.matmul %4, %5, %cst {dimension_numbers = #tpu.dot_dimension_numbers<[1], [1], [0], [0], [0, 0, 1, 0], [], []>} : vector<256x256xbf16>, vector<256x256xbf16>, vector<256x256xf32> -> vector<256x256xf32>
    %7 = arith.addf %3, %6 : vector<256x256xf32>
    %c0_6 = arith.constant 0 : index
    %c0_7 = arith.constant 0 : index
    %8 = vector.load %arg7[%c0_6, %c0_7] : memref<256x256xf32, #tpu.memory_space<vmem>>, vector<256x256xf32>
    tpu.vector_store %arg7[%c0_6, %c0_7], %7 {strides = array<i32>} : memref<256x256xf32, #tpu.memory_space<vmem>>, vector<256x256xf32>,
    %c0_i32_8 = arith.constant 0 : i32
    %9 = arith.cmpi eq, %arg2, %c0_i32_8 : i32
    %10 = arith.extui %9 : i1 to i32
    %c0_i32_9 = arith.constant 0 : i32
    %11 = arith.cmpi ne, %10, %c0_i32_9 : i32
    scf.if %11 {
      %c0_10 = arith.constant 0 : index
      %c0_11 = arith.constant 0 : index
      %12 = vector.load %arg7[%c0_10, %c0_11] : memref<256x256xf32, #tpu.memory_space<vmem>>, vector<256x256xf32>
      %c0_12 = arith.constant 0 : index
      %c0_13 = arith.constant 0 : index
      %13 = vector.load %arg5[%c0_12, %c0_13] : memref<1x256xf32, #tpu.memory_space<vmem>>, vector<1x256xf32>
      %14 = vector.broadcast %13 : vector<1x256xf32> to vector<256x256xf32>
      %15 = arith.addf %12, %14 : vector<256x256xf32>
      %16 = arith.truncf %15 : vector<256x256xf32> to vector<256x256xbf16>
      %c0_14 = arith.constant 0 : index
      %c0_15 = arith.constant 0 : index
      %17 = vector.load %arg6[%c0_14, %c0_15] : memref<256x256xbf16, #tpu.memory_space<vmem>>, vector<256x256xbf16>
      tpu.vector_store %arg6[%c0_14, %c0_15], %16 {strides = array<i32>} : memref<256x256xbf16, #tpu.memory_space<vmem>>, vector<256x256xbf16>,
    } else {
    }
    return
  }
  func.func @transform_0(%arg0: i32, %arg1: i32, %arg2: i32) -> (i32, i32) {
    %c0_i32 = arith.constant 0 : i32
    return %arg0, %arg2 : i32, i32
  }
  func.func @transform_1(%arg0: i32, %arg1: i32, %arg2: i32) -> (i32, i32) {
    %c0_i32 = arith.constant 0 : i32
    return %arg1, %arg2 : i32, i32
  }
  func.func @transform_2(%arg0: i32, %arg1: i32, %arg2: i32) -> (i32, i32) {
    %c0_i32 = arith.constant 0 : i32
    %c0_i32_0 = arith.constant 0 : i32
    return %c0_i32, %arg1 : i32, i32
  }
  func.func @transform_3(%arg0: i32, %arg1: i32, %arg2: i32) -> (i32, i32) {
    %c0_i32 = arith.constant 0 : i32
    return %arg0, %arg1 : i32, i32
  }
}

</mosaic_0001>

<bundles_post_ra>
// kernel: tpu_custom_call.1
= control target key start
LH: loop header
LB: loop body
LE: loop exit
PB: predicated region body
PF: predicated region fallthrough
CT: control target
= control target key end

     0   :  { %s2825_s0 = inlined_call_operand.hbm [shape: bf16[512,256], index: 0, kind: input, shape index: {}]   ;;  %s2826_s1 = inlined_call_operand.hbm [shape: bf16[768,256], index: 1, kind: input, shape index: {}]   ;;  %s2827_s2 = inlined_call_operand.vmem [shape: f32[1,768], index: 2, kind: input, shape index: {}]   ;;  %s2828_s3 = inlined_call_operand.hbm [shape: bf16[512,768], index: 3, kind: output, shape index: {}]  }
   0x1   :  { %2841 = sst [smem:[#allocation16_spill]] %s2825_s0 }
   0x2   :  { %2842 = sst [smem:[#allocation17_spill]] %s2828_s3 }
   0x3   :  { %8 = vsyncpa [#allocation4], 0 }
   0x4   :  { %10 = vsyncpa [#allocation4 + $0x1], 0 }
   0x5   :  { %11 = vsyncpa [#allocation7], 0 }
   0x6   :  { %13 = vsyncpa [#allocation7 + $0x1], 0 }
   0x7   :  { %14 = vsyncpa [#allocation5], 0 }
   0x8   :  { %16 = vsyncpa [#allocation5 + $0x1], 0  ;;  %s2295_s12 = smov 0   ;;  %s2297_s13 = smov 0  }
   0x9   :  { %s2299_s14 = smov 0   ;;  %s2301_s15 = smov 0  }
   0xa   :  { %s2303_s16 = smov 0   ;;  %s2305_s17 = smov 0  }
   0xb   :  { %s2307_s18 = smov 0   ;;  %s2309_s19 = smov 0  }
   0xc   :  { %s2311_s20 = smov 0   ;;  %s2313_s21 = smov 0  }
   0xd   :  { %s2315_s22 = smov 0   ;;  %s2317_s23 = smov 0  }
   0xe   :  { %s2319_s24 = smov 0   ;;  %s2321_s25 = smov 0  }
   0xf LB: > { %2843 = sst [smem:[#allocation12_spill]] %s2257_s23  ;;  %s1634_s26 = sadd.s32 4294967295, %s2265_s25   ;;  %s2265_s25 = sphi %s2321_s25, %s22_s25   ;;  %s2261_s24 = sphi %s2319_s24, %s2883_s24   ;;  %s2257_s23 = sphi %s2317_s23, %s2871_s23   ;;  %s2253_s22 = sphi %s2315_s22, %s2870_s22   ;;  %s2249_s21 = sphi %s2313_s21, %s2869_s21   ;;  %s2245_s20 = sphi %s2311_s20, %s2882_s20   ;;  %s2241_s19 = sphi %s2309_s19, %s2881_s19   ;;  %s2237_s18 = sphi %s2307_s18, %s2880_s18   ;;  %s2233_s17 = sphi %s2305_s17, %s2879_s17   ;;  %s2229_s16 = sphi %s2303_s16, %s2878_s16   ;;  %s2225_s15 = sphi %s2301_s15, %s2877_s15   ;;  %s2221_s14 = sphi %s2299_s14, %s2876_s14   ;;  %s2217_s13 = sphi %s2297_s13, %s2875_s13   ;;  %s2213_s12 = sphi %s2295_s12, %s2874_s12  }
  0x10   : > { %2844 = sst [smem:[#allocation13_spill]] %s2261_s24  ;;  %p57_p0 = scmp.ne.s32.totalorder %s2245_s20, %s2241_s19 }
  0x11   : > { %p2830_p1 = scmp.eq.s32.totalorder %s2265_s25, 0  ;;  %p63_p2 = scmp.ne.s32.totalorder %s2241_s19, %s2237_s18 }
  0x12   : > { %p2372_p3 = scmp.eq.s32.totalorder %s1634_s26, 0  ;;  %p2829_p6 = scmp.lt.s32.totalorder %s2265_s25, 6 }
  0x13   : > { %p59_p4 = por %p2830_p1, %p57_p0  ;;  %s169_s4 = sand.u32 1, %s2245_s20  }
  0x14   : > { %p2380_p5 = por %p2372_p3, %p63_p2  ;;  %s1755_s5 = sshll.u32 %s2261_s24, 12 }
  0x15   : > { %s1638_s6 = sshll.u32 %s169_s4, 8  ;;  %s2847_s0 = sld [smem:[#allocation16_spill]] }
  0x16   : > { %s2846_s30 = scalar_select %p2380_p5, 1, 0 }
  0x17   : > { %s173_s10 = scalar_lea.vmem [#allocation3], %s1638_s6  ;;  %p2394_p7 = pnand %p2829_p6, %p59_p4 }
  0x18   : > { %s183_s11 = sshll.u32 %s173_s10, 4  ;;  %s2400_s28 = scalar_lea.sflag [#allocation4], %s169_s4  ;;  %s2398_s11 = int_to_ptr.vmem [resolvable:$true] %s183_s11 }
  0x19   : > { %p2057_p9 = pneg %p2394_p7 }
  0x1b   : > { %s2390_s9 = scalar_lea.hbm %s2847_s0, %s1755_s5  ;;  %s2060_s8 = scalar_lea.hbm %s2847_s0, 8192 }
  0x1c   : > { %s2055_s7 = scalar_lea.hbm %s2390_s9, 4096  ;;  %p2061_p12 = scmp.lt.u32.totalorder %s2390_s9, %s2847_s0 }
  0x1d   : > { %p2056_p8 = scmp.ne.s32.totalorder %s2390_s9, %s2055_s7  ;;  %p2062_p13 = scmp.lt.u32.totalorder %s2060_s8, %s2055_s7 }
  0x1e   : > { %p2064_p2 = scmp.lt.u32.totalorder %s2055_s7, %s2390_s9 }
  0x1f   : > { %p2058_p10 = pnand %p2057_p9, %p2056_p8  ;;  %p2063_p0 = por %p2062_p13, %p2061_p12 }
  0x21   : > { %p2059_p11 = pneg %p2058_p10  ;;  %p2065_p4 = por %p2064_p2, %p2063_p0 }
  0x23   : > { %p2066_p6 = pnand %p2065_p4, %p2059_p11 }
  0x25   : > { %2069 = shalt.err (!%p2066_p6)
}
  0x26   : > { %s2070_s4 = scalar_lea.vmem %s2398_s11, 4096  ;;  %s2267_s5 = smov [#allocation3]  }
  0x27   : > { %p2071_p8 = scmp.ne.s32.totalorder %s2398_s11, %s2070_s4  ;;  %s2075_s6 = sshll.u32 %s2267_s5, 4  ;;  %s2076_s6 = int_to_ptr.vmem [resolvable:$false] %s2075_s6 }
  0x28   : > { %s2077_s27 = scalar_lea.vmem %s2076_s6, 8192  ;;  %p2078_p5 = scmp.lt.s32.totalorder %s2398_s11, %s2076_s6 }
  0x29   : > { %p2073_p10 = pnand %p2071_p8, %p2057_p9  ;;  %p2079_p12 = scmp.lt.s32.totalorder %s2077_s27, %s2070_s4 }
  0x2b   : > { %p2074_p1 = pneg %p2073_p10  ;;  %p2080_p13 = por %p2079_p12, %p2078_p5 }
  0x2d   : > { %p2081_p0 = pnand %p2080_p13, %p2074_p1 }
  0x2f   : > { %2084 = shalt.err (!%p2081_p0)
}
  0x30   : > { %s2832_s7 = smov 128   ;;  %s2833_s8 = smov 8  }
  0x31   : > { %1832 = dma.hbm_to_vmem [thread:$0]  (!%p2394_p7), %s2390_s9, 4096, %s2398_s11, %s2400_s28, %s2832_s7, %s2832_s7, %s2833_s8  }
  0x32   : > { %p1646_p1 = scmp.ge.s32.totalorder %s2265_s25, 1  ;;  %p223_p5 = scmp.lt.s32.totalorder %s2265_s25, 7 }
  0x33   : > { %p2435_p6 = scmp.eq.s32.totalorder %s1634_s26, 5  ;;  %s1635_s18 = sadd.s32 4294967294, %s2265_s25  }
  0x34   : > { %p2439_p9 = pnand %p1646_p1, %p223_p5  ;;  %s37_s5 = sadd.s32 1, %s2257_s23 }
  0x35   : > { %p39_p7 = scmp.ge.s32.totalorder %s37_s5, 3  ;;  %s78_s28 = sadd.s32 1, %s2233_s17 }
  0x36   : > { %p85_p11 = scmp.ne.s32.totalorder %s2233_s17, %s2229_s16  ;;  %p91_p2 = scmp.ne.s32.totalorder %s2229_s16, %s2225_s15 }
  0x37   : > { %s2885_s5 = smov (%p39_p7, %s37_s5), 0  ;;  %s2852_s26 = sadd.s32 1, %s2261_s24 }
  0x38   : > { %2851 = sst [smem:[#allocation14_spill]] %s2885_s5  ;;  %s2887_s26 = smov (!%p39_p7, %s2852_s26), %s2261_s24 }
  0x39   : > { %s73_s9 = ssub.s32 %s2257_s23, %s2885_s5  ;;  %s132_s11 = sadd.s32 1, %s2221_s14 }
  0x3a   : > { %p43_p4 = scmp.ge.s32.totalorder %s2887_s26, 2  ;;  %p76_p8 = scmp.eq.s32.totalorder %s73_s9, 0 }
  0x3b   : > { %p2460_p10 = por %p91_p2, %p2372_p3  ;;  %p142_p12 = scmp.ne.s32.totalorder %s2221_s14, %s2217_s13 }
  0x3c   : > { %s2889_s26 = smov (%p43_p4, %s2887_s26), 0  ;;  %p148_p1 = scmp.ne.s32.totalorder %s2217_s13, %s2213_s12 }
  0x3d   : > { %s2853_s15 = scalar_select %p2460_p10, 1, 0 }
  0x3e   : > { %2854 = sst [smem:[#allocation15_spill]] %s2889_s26  ;;  %s45_s27 = ssub.s32 %s2261_s24, %s2889_s26 }
  0x3f   : > { %s2469_s6 = scalar_select %p76_p8, %s2233_s17, %s78_s28  }
  0x40   : > { %p2475_p13 = por %p2435_p6, %p142_p12  ;;  %p48_p0 = scmp.eq.s32.totalorder %s45_s27, 0 }
  0x41   : > { %s129_s29 = sor.u32 %s73_s9, %s45_s27  ;;  %s2856_s8 = sadd.s32 1, %s2245_s20 }
  0x42   : > { %s2855_s7 = scalar_select %p2475_p13, 1, 0 }
  0x43   : > { %p130_p3 = scmp.eq.s32.totalorder %s129_s29, 0  ;;  %p149_p5 = scmp.eq.s32.totalorder %s1635_s18, 5 }
  0x44   : > { %s2484_s0 = scalar_select %p48_p0, %s2245_s20, %s2856_s8  }
  0x45   : > { %s2487_s5 = scalar_select %p130_p3, %s2221_s14, %s132_s11  }
  0x46   : > { %s193_s3 = sand.u32 1, %s2233_s17   ;;  %p2857_p7 = scmp.eq.s32.totalorder %s2265_s25, 0 }
  0x47   : > { %s1642_s10 = sshll.u32 %s193_s3, 8  ;;  %p2495_p6 = por %p149_p5, %p148_p1 }
  0x48   : > { %p87_p2 = por %p85_p11, %p2857_p7  ;;  %s1757_s26 = sshll.u32 %s2257_s23, 12 }
  0x49   : > { %s2858_s28 = scalar_select %p2495_p6, 1, 0 }
  0x4a   : > { %s197_s24 = scalar_lea.vmem [#allocation6], %s1642_s10  ;;  %s2503_s8 = scalar_lea.hbm %s2826_s1, %s1757_s26 }
  0x4b   : > { %s207_s9 = sshll.u32 %s197_s24, 4  ;;  %p2859_p11 = scmp.lt.s32.totalorder %s2265_s25, 6  ;;  %s2505_s9 = int_to_ptr.vmem [resolvable:$true] %s207_s9 }
  0x4c   : > { %s2513_s11 = scalar_lea.sflag [#allocation7], %s193_s3  ;;  %s2085_s24 = scalar_lea.hbm %s2503_s8, 4096 }
  0x4d   : > { %p2509_p4 = pnand %p2859_p11, %p87_p2  ;;  %p2086_p8 = scmp.ne.s32.totalorder %s2503_s8, %s2085_s24 }
  0x4e   : > { %s2090_s27 = scalar_lea.hbm %s2826_s1, 12288  ;;  %p2091_p1 = scmp.lt.u32.totalorder %s2503_s8, %s2826_s1 }
  0x4f   : > { %p2087_p12 = pneg %p2509_p4  ;;  %p2092_p5 = scmp.lt.u32.totalorder %s2090_s27, %s2085_s24 }
  0x50   : > { %p2094_p2 = scmp.lt.u32.totalorder %s2085_s24, %s2503_s8 }
  0x51   : > { %p2088_p0 = pnand %p2087_p12, %p2086_p8  ;;  %p2093_p7 = por %p2092_p5, %p2091_p1 }
  0x53   : > { %p2089_p3 = pneg %p2088_p0  ;;  %p2095_p11 = por %p2094_p2, %p2093_p7 }
  0x55   : > { %p2096_p6 = pnand %p2095_p11, %p2089_p3 }
  0x57   : > { %2099 = shalt.err (!%p2096_p6)
}
  0x58   : > { %s2100_s3 = scalar_lea.vmem %s2505_s9, 4096  ;;  %s2270_s26 = smov [#allocation6]  }
  0x59   : > { %p2101_p8 = scmp.ne.s32.totalorder %s2505_s9, %s2100_s3  ;;  %s2105_s10 = sshll.u32 %s2270_s26, 4  ;;  %s2106_s10 = int_to_ptr.vmem [resolvable:$false] %s2105_s10 }
  0x5a   : > { %s2107_s23 = scalar_lea.vmem %s2106_s10, 8192  ;;  %p2108_p10 = scmp.lt.s32.totalorder %s2505_s9, %s2106_s10 }
  0x5b   : > { %p2103_p0 = pnand %p2101_p8, %p2087_p12  ;;  %p2109_p1 = scmp.lt.s32.totalorder %s2107_s23, %s2100_s3 }
  0x5d   : > { %p2104_p13 = pneg %p2103_p0  ;;  %p2110_p5 = por %p2109_p1, %p2108_p10 }
  0x5f   : > { %p2111_p7 = pnand %p2110_p5, %p2104_p13 }
  0x61   : > { %2114 = shalt.err (!%p2111_p7)
}
  0x62   : > { %s2861_s24 = smov 8   ;;  %s2862_s27 = smov 128  }
  0x63   : > { %1835 = dma.hbm_to_vmem [thread:$0]  (!%p2509_p4), %s2503_s8, 4096, %s2505_s9, %s2513_s11, %s2862_s27, %s2862_s27, %s2861_s24  }
  0x64   : > { %227 = sbr.rel (%p2439_p9) target bundleno = 532 (0x214), region = 32  ;;  %s229_s29 = sand.u32 (!%p2439_p9), 1, %s2241_s19  }
  0x65   : > { %s1647_s26 = sshll.u32 (!%p2439_p9), %s229_s29, 8  ;;  %s230_s3 = scalar_lea.sflag (!%p2439_p9), [#allocation4], %s229_s29 }
  0x66   : > { %s2547_s10 = scalar_lea.vmem (!%p2439_p9), [#allocation3], %s1647_s26  ;;  %p2863_p10 = scmp.ne.s32.totalorder (!%p2439_p9), %s2846_s30, 0 }
  0x6b   : > { %2200 = dma.done.wait (%p2863_p10), %s230_s3, 4096  }
  0x6c   : > { %2202 = vsyncadd (%p2863_p10), %s230_s3, 4294963200  ;;  %s238_s18 = sand.u32 1, %s2229_s16   ;;  %p2864_p9 = scmp.ne.s32.totalorder %s2853_s15, 0 }
  0x6d   : > { %s1648_s23 = sshll.u32 %s238_s18, 8  ;;  %s239_s9 = scalar_lea.sflag [#allocation7], %s238_s18 }
  0x6e   : > { %s2554_s8 = scalar_lea.vmem [#allocation6], %s1648_s23 }
  0x6f   : > { %2204 = dma.done.wait (%p2864_p9), %s239_s9, 4096  }
  0x70   : > { %2206 = vsyncadd (%p2864_p9), %s239_s9, 4294963200  ;;  %v1959_v0 = vld [vmem:[%s2554_s8 + $0x4] ss:$8 sps:$4 sm:$0xff]   ;;  %v1961_v1 = vld [vmem:[%s2554_s8] ss:$8 sps:$4 sm:$0xff]   ;;  %s2625_s30 = sshll.u32 %s2249_s21, 1 }
  0x71   : > { %801 = vmatprep.subr.bf16.mxu0 %v1959_v0  ;;  %1790 = vmatprep.subr.bf16.mxu1 %v1959_v0  ;;  %v1962_v2 = vld [vmem:[%s2554_s8 + $0x14] ss:$8 sps:$4 sm:$0xff]   ;;  %v1964_v3 = vld [vmem:[%s2554_s8 + $0x10] ss:$8 sps:$4 sm:$0xff]   ;;  %v1965_v4 = vld [vmem:[%s2554_s8 + $0x24] ss:$8 sps:$4 sm:$0xff]   ;;  %v1191_v0 = vlaneseq }
  0x72   : > { %802 = vmatpush1.bf16.xpose.msra.mxu0 %v1961_v1  ;;  %1806 = vmatpush1.bf16.xpose.msra.mxu1 %v1961_v1  ;;  %v1967_v5 = vld [vmem:[%s2554_s8 + $0x20] ss:$8 sps:$4 sm:$0xff]   ;;  %v1968_v6 = vld [vmem:[%s2554_s8 + $0x34] ss:$8 sps:$4 sm:$0xff]   ;;  %v2009_v7 = vld [vmem:[%s2547_s10 + $0x4] ss:$8 sps:$4 sm:$0xff]  }
  0x73   : > { %803 = vmatprep.subr.bf16.mxu0 %v1962_v2  ;;  %1791 = vmatprep.subr.bf16.mxu1 %v1962_v2  ;;  %v1970_v8 = vld [vmem:[%s2554_s8 + $0x30] ss:$8 sps:$4 sm:$0xff]   ;;  %v2012_v9 = vld [vmem:[%s2547_s10 + $0x84] ss:$8 sps:$4 sm:$0xff]   ;;  %v1973_v11 = vld [vmem:[%s2554_s8 + $0x40] ss:$8 sps:$4 sm:$0xff]  }
  0x74   : > { %v1971_v10 = vld [vmem:[%s2554_s8 + $0x44] ss:$8 sps:$4 sm:$0xff]   ;;  %833 = vmatprep.mubr.bf16.mxu0 %v2009_v7  ;;  %913 = vmatprep.mubr.bf16.mxu1 %v2012_v9  ;;  %v1974_v12 = vld [vmem:[%s2554_s8 + $0x54] ss:$8 sps:$4 sm:$0xff]   ;;  %v1976_v13 = vld [vmem:[%s2554_s8 + $0x50] ss:$8 sps:$4 sm:$0xff]  }
  0x75   : > { %v1977_v14 = vld [vmem:[%s2554_s8 + $0x64] ss:$8 sps:$4 sm:$0xff]   ;;  %v1979_v15 = vld [vmem:[%s2554_s8 + $0x60] ss:$8 sps:$4 sm:$0xff]   ;;  %v1980_v16 = vld [vmem:[%s2554_s8 + $0x74] ss:$8 sps:$4 sm:$0xff]  }
  0x76   : > { %v1982_v17 = vld [vmem:[%s2554_s8 + $0x70] ss:$8 sps:$4 sm:$0xff]   ;;  %v1983_v18 = vld [vmem:[%s2554_s8 + $0x84] ss:$8 sps:$4 sm:$0xff]   ;;  %v1985_v19 = vld [vmem:[%s2554_s8 + $0x80] ss:$8 sps:$4 sm:$0xff]  }
  0x77   : > { %v1986_v20 = vld [vmem:[%s2554_s8 + $0x94] ss:$8 sps:$4 sm:$0xff]   ;;  %v1988_v21 = vld [vmem:[%s2554_s8 + $0x90] ss:$8 sps:$4 sm:$0xff]   ;;  %v1989_v22 = vld [vmem:[%s2554_s8 + $0xa4] ss:$8 sps:$4 sm:$0xff]  }
  0x78   : > { %v1991_v23 = vld [vmem:[%s2554_s8 + $0xa0] ss:$8 sps:$4 sm:$0xff]   ;;  %v1992_v24 = vld [vmem:[%s2554_s8 + $0xb4] ss:$8 sps:$4 sm:$0xff]   ;;  %v1994_v25 = vld [vmem:[%s2554_s8 + $0xb0] ss:$8 sps:$4 sm:$0xff]  }
  0x79   : > { %v1995_v26 = vld [vmem:[%s2554_s8 + $0xc4] ss:$8 sps:$4 sm:$0xff]   ;;  %v1997_v27 = vld [vmem:[%s2554_s8 + $0xc0] ss:$8 sps:$4 sm:$0xff]   ;;  %v1998_v28 = vld [vmem:[%s2554_s8 + $0xd4] ss:$8 sps:$4 sm:$0xff]  }
  0x7a   : > { %804 = vmatpush1.bf16.xpose.msra.mxu0 %v1964_v3  ;;  %1807 = vmatpush1.bf16.xpose.msra.mxu1 %v1964_v3  ;;  %v2000_v29 = vld [vmem:[%s2554_s8 + $0xd0] ss:$8 sps:$4 sm:$0xff]   ;;  %v2001_v30 = vld [vmem:[%s2554_s8 + $0xe4] ss:$8 sps:$4 sm:$0xff]   ;;  %v2003_v31 = vld [vmem:[%s2554_s8 + $0xe0] ss:$8 sps:$4 sm:$0xff]  }
  0x7b   : > { %805 = vmatprep.subr.bf16.mxu0 %v1965_v4  ;;  %1792 = vmatprep.subr.bf16.mxu1 %v1965_v4  ;;  %v2004_v32 = vld [vmem:[%s2554_s8 + $0xf4] ss:$8 sps:$4 sm:$0xff]   ;;  %v2006_v33 = vld [vmem:[%s2554_s8 + $0xf0] ss:$8 sps:$4 sm:$0xff]   ;;  %v2007_v34 = vld [vmem:[%s2547_s10] ss:$8 sps:$4 sm:$0xff]  }
  0x7c   : > { %v2010_v35 = vld [vmem:[%s2547_s10 + $0x80] ss:$8 sps:$4 sm:$0xff]   ;;  %v2013_v36 = vld [vmem:[%s2547_s10 + $0x14] ss:$8 sps:$4 sm:$0xff]   ;;  %v2017_v38 = vld [vmem:[%s2547_s10 + $0x10] ss:$8 sps:$4 sm:$0xff]  }
  0x7d   : > { %v2015_v37 = vld [vmem:[%s2547_s10 + $0x94] ss:$8 sps:$4 sm:$0xff]   ;;  %v2018_v39 = vld [vmem:[%s2547_s10 + $0x90] ss:$8 sps:$4 sm:$0xff]   ;;  %v2019_v40 = vld [vmem:[%s2547_s10 + $0x24] ss:$8 sps:$4 sm:$0xff]  }
  0x7e   : > { %v2021_v41 = vld [vmem:[%s2547_s10 + $0xa4] ss:$8 sps:$4 sm:$0xff]   ;;  %v2023_v42 = vld [vmem:[%s2547_s10 + $0x20] ss:$8 sps:$4 sm:$0xff]   ;;  %v2025_v44 = vld [vmem:[%s2547_s10 + $0x34] ss:$8 sps:$4 sm:$0xff]  }
  0x7f   : > { %v2024_v43 = vld [vmem:[%s2547_s10 + $0xa0] ss:$8 sps:$4 sm:$0xff]   ;;  %v2027_v45 = vld [vmem:[%s2547_s10 + $0xb4] ss:$8 sps:$4 sm:$0xff]   ;;  %v2029_v46 = vld [vmem:[%s2547_s10 + $0x30] ss:$8 sps:$4 sm:$0xff]  }
  0x80   : > { %v2030_v47 = vld [vmem:[%s2547_s10 + $0xb0] ss:$8 sps:$4 sm:$0xff]   ;;  %v2031_v48 = vld [vmem:[%s2547_s10 + $0x44] ss:$8 sps:$4 sm:$0xff]   ;;  %v2035_v50 = vld [vmem:[%s2547_s10 + $0x40] ss:$8 sps:$4 sm:$0xff]  }
  0x81   : > { %v2033_v49 = vld [vmem:[%s2547_s10 + $0xc4] ss:$8 sps:$4 sm:$0xff]   ;;  %v2036_v51 = vld [vmem:[%s2547_s10 + $0xc0] ss:$8 sps:$4 sm:$0xff]   ;;  %v2037_v52 = vld [vmem:[%s2547_s10 + $0x54] ss:$8 sps:$4 sm:$0xff]  }
  0x82   : > { %806 = vmatpush1.bf16.xpose.msra.mxu0 %v1967_v5  ;;  %1808 = vmatpush1.bf16.xpose.msra.mxu1 %v1967_v5  ;;  %v2039_v53 = vld [vmem:[%s2547_s10 + $0xd4] ss:$8 sps:$4 sm:$0xff]   ;;  %v2041_v54 = vld [vmem:[%s2547_s10 + $0x50] ss:$8 sps:$4 sm:$0xff]   ;;  %v2043_v56 = vld [vmem:[%s2547_s10 + $0x64] ss:$8 sps:$4 sm:$0xff]  }
  0x83   : > { %807 = vmatprep.subr.bf16.mxu0 %v1968_v6  ;;  %1793 = vmatprep.subr.bf16.mxu1 %v1968_v6  ;;  %v2042_v55 = vld [vmem:[%s2547_s10 + $0xd0] ss:$8 sps:$4 sm:$0xff]   ;;  %v2045_v57 = vld [vmem:[%s2547_s10 + $0xe4] ss:$8 sps:$4 sm:$0xff]   ;;  %v2047_v58 = vld [vmem:[%s2547_s10 + $0x60] ss:$8 sps:$4 sm:$0xff]  }
  0x84   : > { %v2048_v59 = vld [vmem:[%s2547_s10 + $0xe0] ss:$8 sps:$4 sm:$0xff]   ;;  %v2049_v60 = vld [vmem:[%s2547_s10 + $0x74] ss:$8 sps:$4 sm:$0xff]   ;;  %v2053_v62 = vld [vmem:[%s2547_s10 + $0x70] ss:$8 sps:$4 sm:$0xff]  }
  0x85   : > { %v2051_v61 = vld [vmem:[%s2547_s10 + $0xf4] ss:$8 sps:$4 sm:$0xff]   ;;  %v2054_v63 = vld [vmem:[%s2547_s10 + $0xf0] ss:$8 sps:$4 sm:$0xff]   ;;  %p279_p13 = scmp.lt.s32.totalorder %s2625_s30, 5  ;;  %v1192_v1 = vshrl.u32 %v1191_v0, 7 }
  0x86   : > { %s271_s27 = sand.u32 1, %s2217_s13   ;;  %s1822_s26 = smul.u32 192, %s2253_s22 }
  0x87   : > { %s280_s4 = scalar_select %p279_p13, %s2625_s30, 5  ;;  %v1193_v2 = vsub.s32 0, %v1192_v1  ;;  %v1197_v4 = vsub.s32 1, %v1192_v1 }
  0x88   : > { %s1649_s21 = sshll.u32 %s271_s27, 8  ;;  %s1503_s3 = sadd.s32 %s1822_s26, %s2625_s30 }
  0x89   : > { %s281_s24 = scalar_lea.vmem %s2827_s2, %s280_s4  ;;  %s2647_s29 = scalar_lea.vmem [#allocation8], %s1649_s21 }
  0x8a   : > { %808 = vmatpush1.bf16.xpose.msra.mxu0 %v1970_v8  ;;  %1809 = vmatpush1.bf16.xpose.msra.mxu1 %v1970_v8  ;;  %v1189_v3 = vld [vmem:[%s281_s24] sm:$0x3]  ;;  %s1751_s22 = sshll.u32 %s1503_s3, 6  ;;  %s1506_s10 = sshll.u32 %s2647_s29, 4  ;;  %s2741_s10 = int_to_ptr.vmem [resolvable:$true] %s1506_s10 }
  0x8b   : > { %809 = vmatprep.subr.bf16.mxu0 %v1971_v10  ;;  %1794 = vmatprep.subr.bf16.mxu1 %v1971_v10  ;;  %v2632_v5 = vrot.slane %v1189_v3, %v1193_v2  ;;  %v2635_v6 = vrot.slane %v1189_v3, %v1197_v4  ;;  %s2865_s9 = sld [smem:[#allocation17_spill]]  ;;  %s2749_s30 = scalar_lea.sflag [#allocation5], %s271_s27 }
  0x8c   : > { %s2115_s4 = scalar_lea.vmem %s2741_s10, 4096  ;;  %p2866_p4 = scmp.ne.s32.totalorder %s2855_s7, 0 }
  0x8d   : > { %p2116_p6 = scmp.ne.s32.totalorder %s2741_s10, %s2115_s4  ;;  %s2271_s15 = smov [#allocation8]  }
  0x8e   : > { %s2119_s11 = sshll.u32 %s2271_s15, 4  ;;  %s2120_s11 = int_to_ptr.vmem [resolvable:$false] %s2119_s11 }
  0x8f   : > { %p2117_p12 = pnand %p2116_p6, %p2866_p4  ;;  %s2121_s24 = scalar_lea.vmem %s2120_s11, 8192 }
  0x90   : > { %p2122_p2 = scmp.lt.s32.totalorder %s2741_s10, %s2120_s11  ;;  %p2123_p11 = scmp.lt.s32.totalorder %s2121_s24, %s2115_s4 }
  0x91   : > { %s2739_s8 = scalar_lea.hbm %s2865_s9, %s1751_s22  ;;  %p2118_p3 = pneg %p2117_p12 }
  0x92   : > { %810 = vmatpush1.bf16.xpose.msra.mxu0 %v1973_v11  ;;  %1810 = vmatpush1.bf16.xpose.msra.mxu1 %v1973_v11  ;;  %p2124_p8 = por %p2123_p11, %p2122_p2 }
  0x93   : > { %811 = vmatprep.subr.bf16.mxu0 %v1974_v12  ;;  %1795 = vmatprep.subr.bf16.mxu1 %v1974_v12 }
  0x94   : > { %p2125_p0 = pnand %p2124_p8, %p2118_p3 }
  0x9a   : > { %812 = vmatpush1.bf16.xpose.msra.mxu0 %v1976_v13  ;;  %1811 = vmatpush1.bf16.xpose.msra.mxu1 %v1976_v13 }
  0x9b   : > { %813 = vmatprep.subr.bf16.mxu0 %v1977_v14  ;;  %1796 = vmatprep.subr.bf16.mxu1 %v1977_v14 }
  0xa2   : > { %814 = vmatpush1.bf16.xpose.msra.mxu0 %v1979_v15  ;;  %1812 = vmatpush1.bf16.xpose.msra.mxu1 %v1979_v15 }
  0xa3   : > { %815 = vmatprep.subr.bf16.mxu0 %v1980_v16  ;;  %1797 = vmatprep.subr.bf16.mxu1 %v1980_v16 }
  0xaa   : > { %816 = vmatpush1.bf16.xpose.msra.mxu0 %v1982_v17  ;;  %1813 = vmatpush1.bf16.xpose.msra.mxu1 %v1982_v17 }
  0xab   : > { %817 = vmatprep.subr.bf16.mxu0 %v1983_v18  ;;  %1798 = vmatprep.subr.bf16.mxu1 %v1983_v18 }
  0xb2   : > { %818 = vmatpush1.bf16.xpose.msra.mxu0 %v1985_v19  ;;  %1814 = vmatpush1.bf16.xpose.msra.mxu1 %v1985_v19 }
  0xb3   : > { %819 = vmatprep.subr.bf16.mxu0 %v1986_v20  ;;  %1799 = vmatprep.subr.bf16.mxu1 %v1986_v20 }
  0xba   : > { %820 = vmatpush1.bf16.xpose.msra.mxu0 %v1988_v21  ;;  %1815 = vmatpush1.bf16.xpose.msra.mxu1 %v1988_v21 }
  0xbb   : > { %821 = vmatprep.subr.bf16.mxu0 %v1989_v22  ;;  %1800 = vmatprep.subr.bf16.mxu1 %v1989_v22 }
  0xc2   : > { %822 = vmatpush1.bf16.xpose.msra.mxu0 %v1991_v23  ;;  %1816 = vmatpush1.bf16.xpose.msra.mxu1 %v1991_v23 }
  0xc3   : > { %823 = vmatprep.subr.bf16.mxu0 %v1992_v24  ;;  %1801 = vmatprep.subr.bf16.mxu1 %v1992_v24 }
  0xca   : > { %824 = vmatpush1.bf16.xpose.msra.mxu0 %v1994_v25  ;;  %1817 = vmatpush1.bf16.xpose.msra.mxu1 %v1994_v25 }
  0xcb   : > { %825 = vmatprep.subr.bf16.mxu0 %v1995_v26  ;;  %1802 = vmatprep.subr.bf16.mxu1 %v1995_v26 }
  0xd2   : > { %826 = vmatpush1.bf16.xpose.msra.mxu0 %v1997_v27  ;;  %1818 = vmatpush1.bf16.xpose.msra.mxu1 %v1997_v27 }
  0xd3   : > { %827 = vmatprep.subr.bf16.mxu0 %v1998_v28  ;;  %1803 = vmatprep.subr.bf16.mxu1 %v1998_v28 }
  0xda   : > { %828 = vmatpush1.bf16.xpose.msra.mxu0 %v2000_v29  ;;  %1819 = vmatpush1.bf16.xpose.msra.mxu1 %v2000_v29 }
  0xdb   : > { %829 = vmatprep.subr.bf16.mxu0 %v2001_v30  ;;  %1804 = vmatprep.subr.bf16.mxu1 %v2001_v30 }
  0xe2   : > { %830 = vmatpush1.bf16.xpose.msra.mxu0 %v2003_v31  ;;  %1820 = vmatpush1.bf16.xpose.msra.mxu1 %v2003_v31 }
  0xe3   : > { %831 = vmatprep.subr.bf16.mxu0 %v2004_v32  ;;  %1805 = vmatprep.subr.bf16.mxu1 %v2004_v32 }
  0xea   : > { %832 = vmatpush1.bf16.xpose.msra.mxu0 %v2006_v33  ;;  %1821 = vmatpush1.bf16.xpose.msra.mxu1 %v2006_v33 }
  0xf1   : > { %834 = vmatmul.mubr.bf16.vlgmr.msra.gmra.mrb[0].mxu0 %v2007_v34  ;;  %914 = vmatmul.mubr.bf16.vlgmr.msra.gmra.mrb[0].mxu1 %v2010_v35 }
  0xf2   : > { %843 = vmatprep.mubr.bf16.mxu0 %v2013_v36  ;;  %923 = vmatprep.mubr.bf16.mxu1 %v2015_v37 }
  0xf9   : > { %844 = vmatmul.mubr.bf16.gmra.mrb[4].mxu0 %v2017_v38  ;;  %924 = vmatmul.mubr.bf16.gmra.mrb[4].mxu1 %v2018_v39 }
  0xfa   : > { %853 = vmatprep.mubr.bf16.mxu0 %v2019_v40  ;;  %933 = vmatprep.mubr.bf16.mxu1 %v2021_v41 }
 0x101   : > { %854 = vmatmul.mubr.bf16.gmra.mrb[8].mxu0 %v2023_v42  ;;  %934 = vmatmul.mubr.bf16.gmra.mrb[8].mxu1 %v2024_v43 }
 0x102   : > { %863 = vmatprep.mubr.bf16.mxu0 %v2025_v44  ;;  %943 = vmatprep.mubr.bf16.mxu1 %v2027_v45 }
 0x109   : > { %864 = vmatmul.mubr.bf16.gmra.mrb[12].mxu0 %v2029_v46  ;;  %944 = vmatmul.mubr.bf16.gmra.mrb[12].mxu1 %v2030_v47 }
 0x10a   : > { %873 = vmatprep.mubr.bf16.mxu0 %v2031_v48  ;;  %953 = vmatprep.mubr.bf16.mxu1 %v2033_v49 }
 0x111   : > { %874 = vmatmul.mubr.bf16.gmra.mrb[16].mxu0 %v2035_v50  ;;  %954 = vmatmul.mubr.bf16.gmra.mrb[16].mxu1 %v2036_v51 }
 0x112   : > { %883 = vmatprep.mubr.bf16.mxu0 %v2037_v52  ;;  %963 = vmatprep.mubr.bf16.mxu1 %v2039_v53 }
 0x119   : > { %884 = vmatmul.mubr.bf16.gmra.mrb[20].mxu0 %v2041_v54  ;;  %964 = vmatmul.mubr.bf16.gmra.mrb[20].mxu1 %v2042_v55 }
 0x11a   : > { %893 = vmatprep.mubr.bf16.mxu0 %v2043_v56  ;;  %973 = vmatprep.mubr.bf16.mxu1 %v2045_v57 }
 0x121   : > { %894 = vmatmul.mubr.bf16.gmra.mrb[24].mxu0 %v2047_v58  ;;  %974 = vmatmul.mubr.bf16.gmra.mrb[24].mxu1 %v2048_v59 }
 0x122   : > { %903 = vmatprep.mubr.bf16.mxu0 %v2049_v60  ;;  %983 = vmatprep.mubr.bf16.mxu1 %v2051_v61 }
 0x129   : > { %904 = vmatmul.mubr.bf16.gmra.mrb[28].mxu0 %v2053_v62  ;;  %984 = vmatmul.mubr.bf16.gmra.mrb[28].mxu1 %v2054_v63 }
 0x1c4   : > { %v835_v7 = vpop.f32.mrb[0].mxu0  ;;  %v915_v8 = vpop.f32.mrb[0].mxu1 }
 0x1c5   : > { %v1201_v9 = vadd.f32 %v2632_v5, %v835_v7  ;;  %v1233_v10 = vadd.f32 %v2632_v5, %v915_v8  ;;  %v837_v11 = vpop.f32.mrb[1].mxu0  ;;  %v917_v12 = vpop.f32.mrb[1].mxu1 }
 0x1c6   : > { %v1202_v13 = vadd.f32 %v2635_v6, %v837_v11  ;;  %v1234_v14 = vadd.f32 %v2635_v6, %v917_v12  ;;  %v839_v15 = vpop.f32.mrb[2].mxu0  ;;  %v919_v16 = vpop.f32.mrb[2].mxu1 }
 0x1c7   : > { %v1203_v17 = vadd.f32 %v2632_v5, %v839_v15  ;;  %v1235_v18 = vadd.f32 %v2632_v5, %v919_v16  ;;  %v841_v19 = vpop.f32.mrb[3].mxu0  ;;  %v921_v20 = vpop.f32.mrb[3].mxu1 }
 0x1c8   : > { %v1758_v21 = vpack.c.bf16 %v1202_v13, %v1201_v9  ;;  %v1774_v22 = vpack.c.bf16 %v1234_v14, %v1233_v10  ;;  %v1204_v23 = vadd.f32 %v2635_v6, %v841_v19  ;;  %v1236_v24 = vadd.f32 %v2635_v6, %v921_v20 }
 0x1ca   : > { %1457 = vst [vmem:[%s2647_s29] sm:$0xff] %v1758_v21  ;;  %1473 = vst [vmem:[%s2647_s29 + $0x80] sm:$0xff] %v1774_v22  ;;  %v1759_v25 = vpack.c.bf16 %v1204_v23, %v1203_v17  ;;  %v1775_v26 = vpack.c.bf16 %v1236_v24, %v1235_v18 }
 0x1cc   : > { %1458 = vst [vmem:[%s2647_s29 + $0x8] sm:$0xff] %v1759_v25  ;;  %1474 = vst [vmem:[%s2647_s29 + $0x88] sm:$0xff] %v1775_v26  ;;  %v845_v27 = vpop.f32.mrb[4].mxu0  ;;  %v925_v28 = vpop.f32.mrb[4].mxu1 }
 0x1cd   : > { %v1205_v29 = vadd.f32 %v2632_v5, %v845_v27  ;;  %v1237_v30 = vadd.f32 %v2632_v5, %v925_v28  ;;  %v847_v31 = vpop.f32.mrb[5].mxu0  ;;  %v927_v32 = vpop.f32.mrb[5].mxu1 }
 0x1ce   : > { %v1206_v33 = vadd.f32 %v2635_v6, %v847_v31  ;;  %v1238_v34 = vadd.f32 %v2635_v6, %v927_v32  ;;  %v849_v35 = vpop.f32.mrb[6].mxu0  ;;  %v929_v36 = vpop.f32.mrb[6].mxu1 }
 0x1cf   : > { %v1207_v37 = vadd.f32 %v2632_v5, %v849_v35  ;;  %v1239_v38 = vadd.f32 %v2632_v5, %v929_v36  ;;  %v851_v39 = vpop.f32.mrb[7].mxu0  ;;  %v931_v40 = vpop.f32.mrb[7].mxu1 }
 0x1d0   : > { %v1760_v41 = vpack.c.bf16 %v1206_v33, %v1205_v29  ;;  %v1776_v42 = vpack.c.bf16 %v1238_v34, %v1237_v30  ;;  %v1208_v43 = vadd.f32 %v2635_v6, %v851_v39  ;;  %v1240_v44 = vadd.f32 %v2635_v6, %v931_v40 }
 0x1d2   : > { %1459 = vst [vmem:[%s2647_s29 + $0x10] sm:$0xff] %v1760_v41  ;;  %1475 = vst [vmem:[%s2647_s29 + $0x90] sm:$0xff] %v1776_v42  ;;  %v1761_v45 = vpack.c.bf16 %v1208_v43, %v1207_v37  ;;  %v1777_v46 = vpack.c.bf16 %v1240_v44, %v1239_v38 }
 0x1d4   : > { %1460 = vst [vmem:[%s2647_s29 + $0x18] sm:$0xff] %v1761_v45  ;;  %1476 = vst [vmem:[%s2647_s29 + $0x98] sm:$0xff] %v1777_v46  ;;  %v855_v47 = vpop.f32.mrb[8].mxu0  ;;  %v935_v48 = vpop.f32.mrb[8].mxu1 }
 0x1d5   : > { %v1209_v49 = vadd.f32 %v2632_v5, %v855_v47  ;;  %v1241_v50 = vadd.f32 %v2632_v5, %v935_v48  ;;  %v857_v51 = vpop.f32.mrb[9].mxu0  ;;  %v937_v52 = vpop.f32.mrb[9].mxu1 }
 0x1d6   : > { %v1210_v53 = vadd.f32 %v2635_v6, %v857_v51  ;;  %v1242_v54 = vadd.f32 %v2635_v6, %v937_v52  ;;  %v859_v55 = vpop.f32.mrb[10].mxu0  ;;  %v939_v56 = vpop.f32.mrb[10].mxu1 }
 0x1d7   : > { %v1211_v57 = vadd.f32 %v2632_v5, %v859_v55  ;;  %v1243_v58 = vadd.f32 %v2632_v5, %v939_v56  ;;  %v861_v59 = vpop.f32.mrb[11].mxu0  ;;  %v941_v60 = vpop.f32.mrb[11].mxu1 }
 0x1d8   : > { %v1762_v61 = vpack.c.bf16 %v1210_v53, %v1209_v49  ;;  %v1778_v62 = vpack.c.bf16 %v1242_v54, %v1241_v50  ;;  %v1212_v63 = vadd.f32 %v2635_v6, %v861_v59  ;;  %v1244_v0 = vadd.f32 %v2635_v6, %v941_v60 }
 0x1da   : > { %1461 = vst [vmem:[%s2647_s29 + $0x20] sm:$0xff] %v1762_v61  ;;  %1477 = vst [vmem:[%s2647_s29 + $0xa0] sm:$0xff] %v1778_v62  ;;  %v1763_v1 = vpack.c.bf16 %v1212_v63, %v1211_v57  ;;  %v1779_v2 = vpack.c.bf16 %v1244_v0, %v1243_v58 }
 0x1dc   : > { %1462 = vst [vmem:[%s2647_s29 + $0x28] sm:$0xff] %v1763_v1  ;;  %1478 = vst [vmem:[%s2647_s29 + $0xa8] sm:$0xff] %v1779_v2  ;;  %v865_v3 = vpop.f32.mrb[12].mxu0  ;;  %v945_v4 = vpop.f32.mrb[12].mxu1 }
 0x1dd   : > { %v1213_v7 = vadd.f32 %v2632_v5, %v865_v3  ;;  %v1245_v8 = vadd.f32 %v2632_v5, %v945_v4  ;;  %v867_v9 = vpop.f32.mrb[13].mxu0  ;;  %v947_v10 = vpop.f32.mrb[13].mxu1 }
 0x1de   : > { %v1214_v11 = vadd.f32 %v2635_v6, %v867_v9  ;;  %v1246_v12 = vadd.f32 %v2635_v6, %v947_v10  ;;  %v869_v13 = vpop.f32.mrb[14].mxu0  ;;  %v949_v14 = vpop.f32.mrb[14].mxu1 }
 0x1df   : > { %v1215_v15 = vadd.f32 %v2632_v5, %v869_v13  ;;  %v1247_v16 = vadd.f32 %v2632_v5, %v949_v14  ;;  %v871_v17 = vpop.f32.mrb[15].mxu0  ;;  %v951_v18 = vpop.f32.mrb[15].mxu1 }
 0x1e0   : > { %v1764_v19 = vpack.c.bf16 %v1214_v11, %v1213_v7  ;;  %v1780_v20 = vpack.c.bf16 %v1246_v12, %v1245_v8  ;;  %v1216_v21 = vadd.f32 %v2635_v6, %v871_v17  ;;  %v1248_v22 = vadd.f32 %v2635_v6, %v951_v18 }
 0x1e2   : > { %1463 = vst [vmem:[%s2647_s29 + $0x30] sm:$0xff] %v1764_v19  ;;  %1479 = vst [vmem:[%s2647_s29 + $0xb0] sm:$0xff] %v1780_v20  ;;  %v1765_v23 = vpack.c.bf16 %v1216_v21, %v1215_v15  ;;  %v1781_v24 = vpack.c.bf16 %v1248_v22, %v1247_v16 }
 0x1e4   : > { %1464 = vst [vmem:[%s2647_s29 + $0x38] sm:$0xff] %v1765_v23  ;;  %1480 = vst [vmem:[%s2647_s29 + $0xb8] sm:$0xff] %v1781_v24  ;;  %v875_v25 = vpop.f32.mrb[16].mxu0  ;;  %v955_v26 = vpop.f32.mrb[16].mxu1 }
 0x1e5   : > { %v1217_v27 = vadd.f32 %v2632_v5, %v875_v25  ;;  %v1249_v28 = vadd.f32 %v2632_v5, %v955_v26  ;;  %v877_v29 = vpop.f32.mrb[17].mxu0  ;;  %v957_v30 = vpop.f32.mrb[17].mxu1 }
 0x1e6   : > { %v1218_v31 = vadd.f32 %v2635_v6, %v877_v29  ;;  %v1250_v32 = vadd.f32 %v2635_v6, %v957_v30  ;;  %v879_v33 = vpop.f32.mrb[18].mxu0  ;;  %v959_v34 = vpop.f32.mrb[18].mxu1 }
 0x1e7   : > { %v1219_v35 = vadd.f32 %v2632_v5, %v879_v33  ;;  %v1251_v36 = vadd.f32 %v2632_v5, %v959_v34  ;;  %v881_v37 = vpop.f32.mrb[19].mxu0  ;;  %v961_v38 = vpop.f32.mrb[19].mxu1 }
 0x1e8   : > { %v1766_v39 = vpack.c.bf16 %v1218_v31, %v1217_v27  ;;  %v1782_v40 = vpack.c.bf16 %v1250_v32, %v1249_v28  ;;  %v1220_v41 = vadd.f32 %v2635_v6, %v881_v37  ;;  %v1252_v42 = vadd.f32 %v2635_v6, %v961_v38 }
 0x1ea   : > { %1465 = vst [vmem:[%s2647_s29 + $0x40] sm:$0xff] %v1766_v39  ;;  %1481 = vst [vmem:[%s2647_s29 + $0xc0] sm:$0xff] %v1782_v40  ;;  %v1767_v43 = vpack.c.bf16 %v1220_v41, %v1219_v35  ;;  %v1783_v44 = vpack.c.bf16 %v1252_v42, %v1251_v36 }
 0x1ec   : > { %1466 = vst [vmem:[%s2647_s29 + $0x48] sm:$0xff] %v1767_v43  ;;  %1482 = vst [vmem:[%s2647_s29 + $0xc8] sm:$0xff] %v1783_v44  ;;  %v885_v45 = vpop.f32.mrb[20].mxu0  ;;  %v965_v46 = vpop.f32.mrb[20].mxu1 }
 0x1ed   : > { %v1221_v47 = vadd.f32 %v2632_v5, %v885_v45  ;;  %v1253_v48 = vadd.f32 %v2632_v5, %v965_v46  ;;  %v887_v49 = vpop.f32.mrb[21].mxu0  ;;  %v967_v50 = vpop.f32.mrb[21].mxu1 }
 0x1ee   : > { %v1222_v51 = vadd.f32 %v2635_v6, %v887_v49  ;;  %v1254_v52 = vadd.f32 %v2635_v6, %v967_v50  ;;  %v889_v53 = vpop.f32.mrb[22].mxu0  ;;  %v969_v54 = vpop.f32.mrb[22].mxu1 }
 0x1ef   : > { %v1223_v55 = vadd.f32 %v2632_v5, %v889_v53  ;;  %v1255_v56 = vadd.f32 %v2632_v5, %v969_v54  ;;  %v891_v57 = vpop.f32.mrb[23].mxu0  ;;  %v971_v58 = vpop.f32.mrb[23].mxu1 }
 0x1f0   : > { %v1768_v59 = vpack.c.bf16 %v1222_v51, %v1221_v47  ;;  %v1784_v60 = vpack.c.bf16 %v1254_v52, %v1253_v48  ;;  %v1224_v61 = vadd.f32 %v2635_v6, %v891_v57  ;;  %v1256_v62 = vadd.f32 %v2635_v6, %v971_v58 }
 0x1f2   : > { %1467 = vst [vmem:[%s2647_s29 + $0x50] sm:$0xff] %v1768_v59  ;;  %1483 = vst [vmem:[%s2647_s29 + $0xd0] sm:$0xff] %v1784_v60  ;;  %v1769_v63 = vpack.c.bf16 %v1224_v61, %v1223_v55  ;;  %v1785_v0 = vpack.c.bf16 %v1256_v62, %v1255_v56 }
 0x1f4   : > { %1468 = vst [vmem:[%s2647_s29 + $0x58] sm:$0xff] %v1769_v63  ;;  %1484 = vst [vmem:[%s2647_s29 + $0xd8] sm:$0xff] %v1785_v0  ;;  %v895_v1 = vpop.f32.mrb[24].mxu0  ;;  %v975_v2 = vpop.f32.mrb[24].mxu1 }
 0x1f5   : > { %v1225_v3 = vadd.f32 %v2632_v5, %v895_v1  ;;  %v1257_v4 = vadd.f32 %v2632_v5, %v975_v2  ;;  %v897_v7 = vpop.f32.mrb[25].mxu0  ;;  %v977_v8 = vpop.f32.mrb[25].mxu1 }
 0x1f6   : > { %v1226_v9 = vadd.f32 %v2635_v6, %v897_v7  ;;  %v1258_v10 = vadd.f32 %v2635_v6, %v977_v8  ;;  %v899_v11 = vpop.f32.mrb[26].mxu0  ;;  %v979_v12 = vpop.f32.mrb[26].mxu1 }
 0x1f7   : > { %v1227_v13 = vadd.f32 %v2632_v5, %v899_v11  ;;  %v1259_v14 = vadd.f32 %v2632_v5, %v979_v12  ;;  %v901_v15 = vpop.f32.mrb[27].mxu0  ;;  %v981_v16 = vpop.f32.mrb[27].mxu1 }
 0x1f8   : > { %v1770_v17 = vpack.c.bf16 %v1226_v9, %v1225_v3  ;;  %v1786_v18 = vpack.c.bf16 %v1258_v10, %v1257_v4  ;;  %v1228_v19 = vadd.f32 %v2635_v6, %v901_v15  ;;  %v1260_v20 = vadd.f32 %v2635_v6, %v981_v16 }
 0x1fa   : > { %1469 = vst [vmem:[%s2647_s29 + $0x60] sm:$0xff] %v1770_v17  ;;  %1485 = vst [vmem:[%s2647_s29 + $0xe0] sm:$0xff] %v1786_v18  ;;  %v1771_v21 = vpack.c.bf16 %v1228_v19, %v1227_v13  ;;  %v1787_v22 = vpack.c.bf16 %v1260_v20, %v1259_v14 }
 0x1fc   : > { %1470 = vst [vmem:[%s2647_s29 + $0x68] sm:$0xff] %v1771_v21  ;;  %1486 = vst [vmem:[%s2647_s29 + $0xe8] sm:$0xff] %v1787_v22  ;;  %v905_v23 = vpop.f32.mrb[28].mxu0  ;;  %v985_v24 = vpop.f32.mrb[28].mxu1 }
 0x1fd   : > { %v1229_v25 = vadd.f32 %v2632_v5, %v905_v23  ;;  %v1261_v26 = vadd.f32 %v2632_v5, %v985_v24  ;;  %v907_v27 = vpop.f32.mrb[29].mxu0  ;;  %v987_v28 = vpop.f32.mrb[29].mxu1 }
 0x1fe   : > { %v1230_v29 = vadd.f32 %v2635_v6, %v907_v27  ;;  %v1262_v30 = vadd.f32 %v2635_v6, %v987_v28  ;;  %v909_v31 = vpop.f32.mrb[30].mxu0  ;;  %v989_v32 = vpop.f32.mrb[30].mxu1 }
 0x1ff   : > { %v1231_v33 = vadd.f32 %v2632_v5, %v909_v31  ;;  %v1263_v34 = vadd.f32 %v2632_v5, %v989_v32  ;;  %v911_v35 = vpop.f32.mrb[31].mxu0  ;;  %v991_v36 = vpop.f32.mrb[31].mxu1 }
 0x200   : > { %v1772_v37 = vpack.c.bf16 %v1230_v29, %v1229_v25  ;;  %v1788_v38 = vpack.c.bf16 %v1262_v30, %v1261_v26  ;;  %v1232_v39 = vadd.f32 %v2635_v6, %v911_v35  ;;  %v1264_v40 = vadd.f32 %v2635_v6, %v991_v36 }
 0x202   : > { %1471 = vst [vmem:[%s2647_s29 + $0x70] sm:$0xff] %v1772_v37  ;;  %1487 = vst [vmem:[%s2647_s29 + $0xf0] sm:$0xff] %v1788_v38  ;;  %v1773_v5 = vpack.c.bf16 %v1232_v39, %v1231_v33  ;;  %v1789_v41 = vpack.c.bf16 %v1264_v40, %v1263_v34 }
 0x204   : > { %1472 = vst [vmem:[%s2647_s29 + $0x78] sm:$0xff] %v1773_v5  ;;  %1488 = vst [vmem:[%s2647_s29 + $0xf8] sm:$0xff] %v1789_v41 }
 0x205   : > { %2128 = shalt.err (!%p2125_p0)
}
 0x206   : > { %s2129_s27 = scalar_lea.hbm %s2739_s8, 4096  ;;  %s2133_s26 = scalar_lea.hbm %s2865_s9, 24576 }
 0x207   : > { %p2130_p1 = scmp.ne.s32.totalorder %s2739_s8, %s2129_s27  ;;  %p2134_p10 = scmp.lt.u32.totalorder %s2739_s8, %s2865_s9 }
 0x208   : > { %p2135_p9 = scmp.lt.u32.totalorder %s2133_s26, %s2129_s27  ;;  %p2137_p6 = scmp.lt.u32.totalorder %s2129_s27, %s2739_s8 }
 0x209   : > { %p2131_p5 = pnand %p2130_p1, %p2866_p4 }
 0x20a   : > { %p2136_p13 = por %p2135_p9, %p2134_p10 }
 0x20b   : > { %p2132_p7 = pneg %p2131_p5 }
 0x20c   : > { %p2138_p12 = por %p2137_p6, %p2136_p13 }
 0x20e   : > { %p2139_p3 = pnand %p2138_p12, %p2132_p7 }
 0x210   : > { %2142 = shalt.err (!%p2139_p3)
}
 0x211   : > { %s2272_s18 = smov 128   ;;  %s2273_s23 = smov 384  }
 0x212   : > { %s2274_s4 = smov 8  }
 0x213   : > { %1827 = dma.vmem_to_hbm [thread:$0]  (%p2866_p4), %s2741_s10, 4096, %s2739_s8, %s2749_s30, %s2272_s18, %s2273_s23, %s2274_s4  }
 0x214 PF: > { %p1841_p2 = scmp.ge.s32.totalorder %s2265_s25, 2  ;;  %s1521_s15 = sand.u32 1, %s2213_s12  }
 0x215   : > { %p2867_p11 = scmp.ne.s32.totalorder %s2858_s28, 0  ;;  %s1522_s11 = scalar_lea.sflag [#allocation5], %s1521_s15 }
 0x217   : > { %p1837_p8 = pnand %p1841_p2, %p2867_p11 }
 0x219   : > { %2208 = dma.done.wait (!%p1837_p8), %s1522_s11, 4096  }
 0x21a   : > { %2210 = vsyncadd (!%p1837_p8), %s1522_s11, 4294963200  ;;  %s22_s25 = sadd.s32 1, %s2265_s25   ;;  %s2869_s21 = sld [smem:[#allocation12_spill]] }
 0x21b   : > { %p2778_p0 = scmp.ge.s32.totalorder %s22_s25, 8   ;;  %s2870_s22 = sld [smem:[#allocation13_spill]] }
 0x21c   : > { %s2871_s23 = sld [smem:[#allocation14_spill]]  ;;  %s2872_s7 = sld [smem:[#allocation15_spill]] }
 0x21d   : > { %s2874_s12 = smov %s2217_s13  ;;  %s2875_s13 = smov %s2221_s14 }
 0x21e   : > { %s2876_s14 = smov %s2487_s5  ;;  %s2877_s15 = smov %s2229_s16 }
 0x21f   : > { %s2878_s16 = smov %s2233_s17  ;;  %s2879_s17 = smov %s2469_s6 }
 0x220   : > { %s2880_s18 = smov %s2241_s19  ;;  %s2881_s19 = smov %s2245_s20 }
 0x221   : > { %s2882_s20 = smov %s2484_s0  ;;  %21 = sbr.rel (!%p2778_p0) target bundleno = 15 (0xf), region = 101 }
 0x222   : > { %s2883_s24 = smov %s2872_s7 }
 0x228   :  { %1527 = vsyncpa [#allocation4], 1 }
 0x229   :  { %1529 = vsyncpa [#allocation4 + $0x1], 1 }
 0x22a   :  { %1530 = vsyncpa [#allocation7], 1 }
 0x22b   :  { %1532 = vsyncpa [#allocation7 + $0x1], 1 }
 0x22c   :  { %1533 = vsyncpa [#allocation5], 1 }
 0x22d   :  { %1535 = vsyncpa [#allocation5 + $0x1], 1 }

</bundles_post_ra>
